<compile_context>
chip_gen: v5e
topology: v5e:2x2
jax: 0.10.0
libtpu: 0.0.40
codegen_flags: <defaults>
</compile_context>

<pallas_src>
import functools

import jax
import jax.numpy as jnp
from jax.experimental import pallas as pl
from jax.experimental.pallas import tpu as pltpu


# ------------------------------ kernel helpers --------------------------------
_NN = (((1,), (0,)), ((), ()))   # A @ B
_NT = (((1,), (1,)), ((), ()))   # A @ B^T  (contract shared last axis)
_TN = (((0,), (0,)), ((), ()))   # A^T @ B  (contract shared first axis)


def _dot(a, b, dims=_NN):
    return jax.lax.dot_general(a, b, dims, preferred_element_type=jnp.float32)


def _onehot(idx_1e, n_classes):
    # idx: (1, E) lane-major int32 -> (n_classes, E) one-hot bf16 (0/1 exact in bf16)
    cls = jax.lax.broadcasted_iota(jnp.int32, (n_classes, idx_1e.shape[1]), 0)
    return (cls == idx_1e).astype(jnp.float32).astype(jnp.bfloat16)


def _leaky_relu(x, slope=0.01):  # F.leaky_relu default slope, f32 on the VPU
    return jnp.where(x >= 0.0, x, slope * x)


# ------------------------------ fused forward kernel ---------------------------
def _gnn_forward_kernel(idx_ref, x_c_ref, x_v_ref, w_ref, b_ref, prob_ref, emb_ref, *, meta):
    e1, e2, nl = meta["e_cv"], meta["e_vc"], meta["n_lbl"]
    n_mid = meta["n_mid"]
    w_cols, b_cols = meta["w_cols"], meta["b_cols"]
    n_c, n_v = x_c_ref.shape[0], x_v_ref.shape[0]
    bf16 = jnp.bfloat16

    def w_at(i):
        off, k, n = w_cols[i]
        return w_ref[0:k, off:off + n]          # static slice of the bf16 weight slab

    def b_at(i):
        off, n = b_cols[i]
        return b_ref[:, off:off + n]            # (1, n) f32

    def idx_at(off, n):
        return idx_ref[:, off:off + n]          # (1, n) int32, lane-major

    # ---- packed lane-major index segments ----
    cv_src = idx_at(0, e1)
    cv_dst = idx_at(e1, e1)
    vc_src = idx_at(2 * e1, e2)
    vc_dst = idx_at(2 * e1 + e2, e2)
    lbl_row = idx_at(2 * e1 + 2 * e2, nl)
    lbl_col = idx_at(2 * e1 + 2 * e2 + nl, nl)

    x_c = x_c_ref[...]                          # bf16 features
    x_v = x_v_ref[...]

    # ---- edge-count matrices + inverse degrees (shared by both encoder layers) ----
    # counts[d, s] = #edges d<-s, from (n_dst,E) x (n_src,E) one-hots via A @ B^T on the MXU.
    cnt_v = _dot(_onehot(cv_dst, n_v), _onehot(cv_src, n_c), _NT)   # (n_v, n_c) f32
    cnt_c = _dot(_onehot(vc_dst, n_c), _onehot(vc_src, n_v), _NT)   # (n_c, n_v) f32
    inv_v = pl.reciprocal(jnp.maximum(jnp.sum(cnt_v, axis=1, keepdims=True), 1.0), approx=True)
    inv_c = pl.reciprocal(jnp.maximum(jnp.sum(cnt_c, axis=1, keepdims=True), 1.0), approx=True)
    cnt_v = cnt_v.astype(bf16)
    cnt_c = cnt_c.astype(bf16)

    def sage(cnt, inv, x_src, x_dst, i_wl, i_wr, i_b, relu):
        # SAGEConv(mean): lin_l(mean_nbr(x_src)) + lin_r(x_dst) + b
        # (normalize AFTER the count matmul; bf16 MXU operands, f32 accumulation)
        agg = (_dot(cnt, x_src) * inv).astype(bf16)
        h = _dot(agg, w_at(i_wl)) + _dot(x_dst, w_at(i_wr)) + b_at(i_b)
        return jnp.maximum(h, 0.0) if relu else h

    # ---- encoder layer 1 (hetero SAGEConv + ReLU) ----
    h_v = sage(cnt_v, inv_v, x_c, x_v, 0, 1, 0, True).astype(bf16)    # (n_v, hidden)
    h_c = sage(cnt_c, inv_c, x_v, x_c, 2, 3, 1, True).astype(bf16)    # (n_c, hidden)

    # ---- encoder layer 2 (no activation) ----
    emb_v = sage(cnt_v, inv_v, h_c, h_v, 4, 5, 2, False)              # (n_v, out) f32
    emb_c = sage(cnt_c, inv_c, h_v, h_c, 6, 7, 3, False)              # (n_c, out) f32
    emb_ref[0:n_c, :] = emb_c                                         # packed embedding slab
    emb_ref[n_c:n_c + n_v, :] = emb_v

    # ---- MLP decoder ----
    # gather emb[index] via one-hot selection, contracting over the node axis (A^T @ B)
    zc = _dot(_onehot(lbl_row, n_c), emb_c.astype(bf16), _TN)         # (L, out) == emb_c[row]
    zv = _dot(_onehot(lbl_col, n_v), emb_v.astype(bf16), _TN)         # (L, out) == emb_v[col]
    # dropout(p=0.0) is the identity; Linear on concat([zc, zv]) == split matmuls (concat-free)
    z = _leaky_relu(_dot(zc.astype(bf16), w_at(8)) + _dot(zv.astype(bf16), w_at(9)) + b_at(4))
    for i in range(n_mid):
        z = _leaky_relu(_dot(z.astype(bf16), w_at(10 + i)) + b_at(5 + i))
    logit = _dot(z.astype(bf16), w_at(10 + n_mid)) + b_at(5 + n_mid)  # (L, 1) f32
    # sigmoid: exp + reciprocal both ride the EUP slot; min() guards approx-recip overshoot
    prob_ref[...] = jnp.minimum(pl.reciprocal(1.0 + jnp.exp(-logit), approx=True), 1.0)


# ------------------------------ parameter packing -------------------------------
def _pack_params(params):
    """Pack every Linear weight into one bf16 slab and every bias into one f32 slab.

    Returns (w_slab, b_slab, w_cols, b_cols); layouts are static (col_offset, rows, cols)."""
    w_list, b_list = [], []
    for name in ("conv1_c2v", "conv1_v2c", "conv2_c2v", "conv2_v2c"):
        p = params[name]
        w_list += [p["w_l"], p["w_r"]]
        b_list.append(p["b"])
    d0 = params["dec_lin0"]
    w_list += [d0["w_c"], d0["w_v"]]
    b_list.append(d0["b"])
    for w, b in params["dec_mid"]:
        w_list.append(w)
        b_list.append(b)
    w_list.append(params["dec_out"]["w"])
    b_list.append(params["dec_out"]["b"])

    k_max = max(w.shape[0] for w in w_list)
    w_cols, padded, off = [], [], 0
    for w in w_list:
        k, n = w.shape
        w_cols.append((off, k, n))
        off += n
        padded.append(jnp.pad(w, ((0, k_max - k), (0, 0))))
    w_slab = jnp.concatenate(padded, axis=1).astype(jnp.bfloat16)

    b_cols, rows, boff = [], [], 0
    for b in b_list:
        n = b.shape[-1]
        b_cols.append((boff, n))
        boff += n
        rows.append(jnp.reshape(b, (1, n)).astype(jnp.float32))
    b_slab = jnp.concatenate(rows, axis=1)
    return w_slab, b_slab, tuple(w_cols), tuple(b_cols)


# ------------------------------ wrapper (single call) ---------------------------
def gnn_model_forward(params, x_dict, edge_index_dict, edge_label_index):
    # bf16 features (they are only ever MXU operands); non-matmul math stays f32 in-kernel.
    x_c = x_dict["customer"].astype(jnp.bfloat16)
    x_v = x_dict["variant"].astype(jnp.bfloat16)
    n_c, n_v = x_c.shape[0], x_v.shape[0]

    ei_cv = edge_index_dict[("customer", "to", "variant")]     # src=customer, dst=variant
    ei_vc = edge_index_dict[("variant", "rev_to", "customer")]
    e1, e2 = ei_cv.shape[1], ei_vc.shape[1]
    n_lbl = edge_label_index.shape[1]

    # ONE lane-major int32 DMA for all edge / label indices.
    idx_pack = jnp.concatenate(
        [ei_cv[0], ei_cv[1], ei_vc[0], ei_vc[1], edge_label_index[0], edge_label_index[1]]
    ).astype(jnp.int32)[None, :]                               # (1, 2*E1 + 2*E2 + 2*L)

    w_slab, b_slab, w_cols, b_cols = _pack_params(params)
    n_mid = len(params["dec_mid"])
    out_ch = params["conv2_c2v"]["w_l"].shape[1]

    meta = dict(e_cv=e1, e_vc=e2, n_lbl=n_lbl, n_mid=n_mid, w_cols=w_cols, b_cols=b_cols)
    operands = (idx_pack, x_c, x_v, w_slab, b_slab)

    # Single fused, grid-less kernel: 5 input DMAs, whole working set resident in VMEM.
    # TODO(synk): for large graphs (v7x 64 MiB VMEM) tile the destination-node axis of the
    # dense count matrices with a grid + PrefetchScalarGridSpec-driven gather.
    prob, emb = pl.pallas_call(
        functools.partial(_gnn_forward_kernel, meta=meta),
        out_shape=(
            jax.ShapeDtypeStruct((n_lbl, 1), jnp.float32),
            jax.ShapeDtypeStruct((n_c + n_v, out_ch), jnp.float32),
        ),
        in_specs=[pl.BlockSpec(op.shape, lambda: (0, 0)) for op in operands],
        out_specs=(
            pl.BlockSpec((n_lbl, 1), lambda: (0, 0)),
            pl.BlockSpec((n_c + n_v, out_ch), lambda: (0, 0)),
        ),
        compiler_params=pltpu.CompilerParams(vmem_limit_bytes=32 * 1024 * 1024),
    )(*operands)

    dec = jnp.concatenate([prob, 1.0 - prob], axis=1)          # [p, 1-p] epilogue (XLA side)
    return dec, {"customer": emb[:n_c], "variant": emb[n_c:]}


# ------------------------------ deterministic init ------------------------------
def _linear_init(key, fan_in, fan_out):
    kw, kb = jax.random.split(key)
    bound = 1.0 / jnp.sqrt(jnp.float32(fan_in))
    w = jax.random.uniform(kw, (fan_in, fan_out), jnp.float32, -bound, bound)
    b = jax.random.uniform(kb, (fan_out,), jnp.float32, -bound, bound)
    return w, b


def _split_conv_init(key, in_src, in_dst, out):
    # torch Linear on concat([aggr_src, x_dst]) == aggr @ W_l + x_dst @ W_r + b
    # (forward math identical to PyG SAGEConv lin_l/lin_r; init bounds differ slightly).
    w, b = _linear_init(key, in_src + in_dst, out)
    return {"w_l": w[:in_src], "w_r": w[in_src:], "b": b}


def init_params(key, in_c, in_v, hidden, out, dec_hidden):
    keys = jax.random.split(key, 5 + len(dec_hidden))
    params = {
        "conv1_c2v": _split_conv_init(keys[0], in_c, in_v, hidden),   # src=c, dst=v
        "conv1_v2c": _split_conv_init(keys[1], in_v, in_c, hidden),   # src=v, dst=c
        "conv2_c2v": _split_conv_init(keys[2], hidden, hidden, out),
        "conv2_v2c": _split_conv_init(keys[3], hidden, hidden, out),
    }
    # decoder first layer: Linear(2*out -> dec_hidden[0]) split over [emb_c | emb_v]
    w, b = _linear_init(keys[4], 2 * out, dec_hidden[0])
    params["dec_lin0"] = {"w_c": w[:out], "w_v": w[out:], "b": b}
    mid = []
    for i in range(1, len(dec_hidden)):
        w, b = _linear_init(keys[4 + i], dec_hidden[i - 1], dec_hidden[i])
        mid.append((w, b))
    params["dec_mid"] = mid
    w, b = _linear_init(keys[4 + len(dec_hidden)], dec_hidden[-1], 1)
    params["dec_out"] = {"w": w, "b": b}
    return params


# ------------------------------------ main --------------------------------------
if __name__ == "__main__":
    key = jax.random.PRNGKey(0)
    k_xc, k_xv, k_e, k_row, k_col = jax.random.split(key, 5)

    n_customer, n_variant = 16, 24
    in_c, in_v = 12, 10
    hidden, out_ch = 32, 32
    dec_hidden = [32, 16]
    n_edges, n_label = 64, 20

    x_dict = {
        "customer": jax.random.normal(k_xc, (n_customer, in_c), jnp.float32),
        "variant": jax.random.normal(k_xv, (n_variant, in_v), jnp.float32),
    }
    src = jax.random.randint(k_e, (n_edges,), 0, n_customer)
    dst = jax.random.randint(jax.random.fold_in(k_e, 1), (n_edges,), 0, n_variant)
    edge_index_dict = {
        ("customer", "to", "variant"): jnp.stack([src, dst]),
        ("variant", "rev_to", "customer"): jnp.stack([dst, src]),
    }
    edge_label_index = jnp.stack(
        [
            jax.random.randint(k_row, (n_label,), 0, n_customer),
            jax.random.randint(k_col, (n_label,), 0, n_variant),
        ]
    )

    params = init_params(jax.random.PRNGKey(42), in_c, in_v, hidden, out_ch, dec_hidden)

    fwd = jax.jit(gnn_model_forward)
    dec_out, emb_dict = fwd(params, x_dict, edge_index_dict, edge_label_index)
    jax.block_until_ready((dec_out, emb_dict))

    assert dec_out.shape == (n_label, 2)
    assert emb_dict["customer"].shape == (n_customer, out_ch)
    assert emb_dict["variant"].shape == (n_variant, out_ch)
    assert bool(jnp.all(jnp.isfinite(dec_out)))
    assert bool(jnp.all((dec_out >= 0.0) & (dec_out <= 1.0)))
    print("KERNEL_OK")
</pallas_src>

<mosaic_0001>
module attributes {stable_mosaic.version = 11 : i64} {
  func.func @_gnn_forward_kernel(%arg0: memref<1x296xi32, #tpu.memory_space<vmem>>, %arg1: memref<16x12xbf16, #tpu.memory_space<vmem>>, %arg2: memref<24x10xbf16, #tpu.memory_space<vmem>>, %arg3: memref<32x337xbf16, #tpu.memory_space<vmem>>, %arg4: memref<1x177xf32, #tpu.memory_space<vmem>>, %arg5: memref<20x1xf32, #tpu.memory_space<vmem>>, %arg6: memref<40x32xf32, #tpu.memory_space<vmem>>) attributes {dimension_semantics = [], scalar_prefetch = 0 : i64, scratch_operands = 0 : i64, tpu.core_type = #tpu.core_type<tc>} {
    %c0 = arith.constant 0 : index
    %c0_0 = arith.constant 0 : index
    %0 = vector.load %arg0[%c0, %c0_0] : memref<1x296xi32, #tpu.memory_space<vmem>>, vector<1x64xi32>
    %c0_1 = arith.constant 0 : index
    %c64 = arith.constant 64 : index
    %1 = vector.load %arg0[%c0_1, %c64] : memref<1x296xi32, #tpu.memory_space<vmem>>, vector<1x64xi32>
    %c0_2 = arith.constant 0 : index
    %c128 = arith.constant 128 : index
    %2 = vector.load %arg0[%c0_2, %c128] : memref<1x296xi32, #tpu.memory_space<vmem>>, vector<1x64xi32>
    %c0_3 = arith.constant 0 : index
    %c192 = arith.constant 192 : index
    %3 = vector.load %arg0[%c0_3, %c192] : memref<1x296xi32, #tpu.memory_space<vmem>>, vector<1x64xi32>
    %c0_4 = arith.constant 0 : index
    %c256 = arith.constant 256 : index
    %4 = vector.load %arg0[%c0_4, %c256] : memref<1x296xi32, #tpu.memory_space<vmem>>, vector<1x20xi32>
    %c0_5 = arith.constant 0 : index
    %c276 = arith.constant 276 : index
    %5 = vector.load %arg0[%c0_5, %c276] : memref<1x296xi32, #tpu.memory_space<vmem>>, vector<1x20xi32>
    %c0_6 = arith.constant 0 : index
    %c0_7 = arith.constant 0 : index
    %6 = vector.load %arg1[%c0_6, %c0_7] : memref<16x12xbf16, #tpu.memory_space<vmem>>, vector<16x12xbf16>
    %c0_8 = arith.constant 0 : index
    %c0_9 = arith.constant 0 : index
    %7 = vector.load %arg2[%c0_8, %c0_9] : memref<24x10xbf16, #tpu.memory_space<vmem>>, vector<24x10xbf16>
    %8 = tpu.iota {dimensions = array<i32: 0>} : vector<24x64xi32>
    %9 = vector.broadcast %1 : vector<1x64xi32> to vector<24x64xi32>
    %10 = arith.cmpi eq, %8, %9 : vector<24x64xi32>
    %11 = arith.extui %10 : vector<24x64xi1> to vector<24x64xi32>
    %12 = arith.sitofp %11 : vector<24x64xi32> to vector<24x64xf32>
    %13 = arith.truncf %12 : vector<24x64xf32> to vector<24x64xbf16>
    %14 = tpu.iota {dimensions = array<i32: 0>} : vector<16x64xi32>
    %15 = vector.broadcast %0 : vector<1x64xi32> to vector<16x64xi32>
    %16 = arith.cmpi eq, %14, %15 : vector<16x64xi32>
    %17 = arith.extui %16 : vector<16x64xi1> to vector<16x64xi32>
    %18 = arith.sitofp %17 : vector<16x64xi32> to vector<16x64xf32>
    %19 = arith.truncf %18 : vector<16x64xf32> to vector<16x64xbf16>
    %cst = arith.constant dense<0.000000e+00> : vector<24x16xf32>
    %20 = tpu.matmul %13, %19, %cst {dimension_numbers = #tpu.dot_dimension_numbers<[1], [1], [0], [0], [0, 0, 1, 0], [], []>} : vector<24x64xbf16>, vector<16x64xbf16>, vector<24x16xf32> -> vector<24x16xf32>
    %21 = tpu.iota {dimensions = array<i32: 0>} : vector<16x64xi32>
    %22 = vector.broadcast %3 : vector<1x64xi32> to vector<16x64xi32>
    %23 = arith.cmpi eq, %21, %22 : vector<16x64xi32>
    %24 = arith.extui %23 : vector<16x64xi1> to vector<16x64xi32>
    %25 = arith.sitofp %24 : vector<16x64xi32> to vector<16x64xf32>
    %26 = arith.truncf %25 : vector<16x64xf32> to vector<16x64xbf16>
    %27 = tpu.iota {dimensions = array<i32: 0>} : vector<24x64xi32>
    %28 = vector.broadcast %2 : vector<1x64xi32> to vector<24x64xi32>
    %29 = arith.cmpi eq, %27, %28 : vector<24x64xi32>
    %30 = arith.extui %29 : vector<24x64xi1> to vector<24x64xi32>
    %31 = arith.sitofp %30 : vector<24x64xi32> to vector<24x64xf32>
    %32 = arith.truncf %31 : vector<24x64xf32> to vector<24x64xbf16>
    %cst_10 = arith.constant dense<0.000000e+00> : vector<16x24xf32>
    %33 = tpu.matmul %26, %32, %cst_10 {dimension_numbers = #tpu.dot_dimension_numbers<[1], [1], [0], [0], [0, 0, 1, 0], [], []>} : vector<16x64xbf16>, vector<24x64xbf16>, vector<16x24xf32> -> vector<16x24xf32>
    %cst_11 = arith.constant dense<0.000000e+00> : vector<24xf32>
    %34 = vector.multi_reduction <add>, %20, %cst_11 [1] : vector<24x16xf32> to vector<24xf32>
    %35 = vector.shape_cast %34 : vector<24xf32> to vector<24x1xf32>
    %cst_12 = arith.constant 1.000000e+00 : f32
    %36 = vector.broadcast %cst_12 : f32 to vector<24x1xf32>
    %37 = arith.maximumf %35, %36 : vector<24x1xf32>
    %38 = tpu.reciprocal %37 {approx = true} : vector<24x1xf32> -> vector<24x1xf32>
    %cst_13 = arith.constant dense<0.000000e+00> : vector<16xf32>
    %39 = vector.multi_reduction <add>, %33, %cst_13 [1] : vector<16x24xf32> to vector<16xf32>
    %40 = vector.shape_cast %39 : vector<16xf32> to vector<16x1xf32>
    %cst_14 = arith.constant 1.000000e+00 : f32
    %41 = vector.broadcast %cst_14 : f32 to vector<16x1xf32>
    %42 = arith.maximumf %40, %41 : vector<16x1xf32>
    %43 = tpu.reciprocal %42 {approx = true} : vector<16x1xf32> -> vector<16x1xf32>
    %44 = arith.truncf %20 : vector<24x16xf32> to vector<24x16xbf16>
    %45 = arith.truncf %33 : vector<16x24xf32> to vector<16x24xbf16>
    %cst_15 = arith.constant dense<0.000000e+00> : vector<24x12xf32>
    %46 = tpu.matmul %44, %6, %cst_15 {dimension_numbers = #tpu.dot_dimension_numbers<[1], [0], [0], [1], [0, 0, 1, 1], [], []>} : vector<24x16xbf16>, vector<16x12xbf16>, vector<24x12xf32> -> vector<24x12xf32>
    %47 = vector.broadcast %38 : vector<24x1xf32> to vector<24x12xf32>
    %48 = arith.mulf %46, %47 : vector<24x12xf32>
    %49 = arith.truncf %48 : vector<24x12xf32> to vector<24x12xbf16>
    %c0_16 = arith.constant 0 : index
    %c0_17 = arith.constant 0 : index
    %50 = vector.load %arg3[%c0_16, %c0_17] : memref<32x337xbf16, #tpu.memory_space<vmem>>, vector<12x32xbf16>
    %cst_18 = arith.constant dense<0.000000e+00> : vector<24x32xf32>
    %51 = tpu.matmul %49, %50, %cst_18 {dimension_numbers = #tpu.dot_dimension_numbers<[1], [0], [0], [1], [0, 0, 1, 1], [], []>} : vector<24x12xbf16>, vector<12x32xbf16>, vector<24x32xf32> -> vector<24x32xf32>
    %c0_19 = arith.constant 0 : index
    %c32 = arith.constant 32 : index
    %52 = vector.load %arg3[%c0_19, %c32] : memref<32x337xbf16, #tpu.memory_space<vmem>>, vector<10x32xbf16>
    %cst_20 = arith.constant dense<0.000000e+00> : vector<24x32xf32>
    %53 = tpu.matmul %7, %52, %cst_20 {dimension_numbers = #tpu.dot_dimension_numbers<[1], [0], [0], [1], [0, 0, 1, 1], [], []>} : vector<24x10xbf16>, vector<10x32xbf16>, vector<24x32xf32> -> vector<24x32xf32>
    %54 = arith.addf %51, %53 : vector<24x32xf32>
    %c0_21 = arith.constant 0 : index
    %c0_22 = arith.constant 0 : index
    %55 = vector.load %arg4[%c0_21, %c0_22] : memref<1x177xf32, #tpu.memory_space<vmem>>, vector<1x32xf32>
    %56 = vector.broadcast %55 : vector<1x32xf32> to vector<24x32xf32>
    %57 = arith.addf %54, %56 : vector<24x32xf32>
    %cst_23 = arith.constant 0.000000e+00 : f32
    %58 = vector.broadcast %cst_23 : f32 to vector<24x32xf32>
    %59 = arith.maximumf %57, %58 : vector<24x32xf32>
    %60 = arith.truncf %59 : vector<24x32xf32> to vector<24x32xbf16>
    %cst_24 = arith.constant dense<0.000000e+00> : vector<16x10xf32>
    %61 = tpu.matmul %45, %7, %cst_24 {dimension_numbers = #tpu.dot_dimension_numbers<[1], [0], [0], [1], [0, 0, 1, 1], [], []>} : vector<16x24xbf16>, vector<24x10xbf16>, vector<16x10xf32> -> vector<16x10xf32>
    %62 = vector.broadcast %43 : vector<16x1xf32> to vector<16x10xf32>
    %63 = arith.mulf %61, %62 : vector<16x10xf32>
    %64 = arith.truncf %63 : vector<16x10xf32> to vector<16x10xbf16>
    %c0_25 = arith.constant 0 : index
    %c64_26 = arith.constant 64 : index
    %65 = vector.load %arg3[%c0_25, %c64_26] : memref<32x337xbf16, #tpu.memory_space<vmem>>, vector<10x32xbf16>
    %cst_27 = arith.constant dense<0.000000e+00> : vector<16x32xf32>
    %66 = tpu.matmul %64, %65, %cst_27 {dimension_numbers = #tpu.dot_dimension_numbers<[1], [0], [0], [1], [0, 0, 1, 1], [], []>} : vector<16x10xbf16>, vector<10x32xbf16>, vector<16x32xf32> -> vector<16x32xf32>
    %c0_28 = arith.constant 0 : index
    %c96 = arith.constant 96 : index
    %67 = vector.load %arg3[%c0_28, %c96] : memref<32x337xbf16, #tpu.memory_space<vmem>>, vector<12x32xbf16>
    %cst_29 = arith.constant dense<0.000000e+00> : vector<16x32xf32>
    %68 = tpu.matmul %6, %67, %cst_29 {dimension_numbers = #tpu.dot_dimension_numbers<[1], [0], [0], [1], [0, 0, 1, 1], [], []>} : vector<16x12xbf16>, vector<12x32xbf16>, vector<16x32xf32> -> vector<16x32xf32>
    %69 = arith.addf %66, %68 : vector<16x32xf32>
    %c0_30 = arith.constant 0 : index
    %c32_31 = arith.constant 32 : index
    %70 = vector.load %arg4[%c0_30, %c32_31] : memref<1x177xf32, #tpu.memory_space<vmem>>, vector<1x32xf32>
    %71 = vector.broadcast %70 : vector<1x32xf32> to vector<16x32xf32>
    %72 = arith.addf %69, %71 : vector<16x32xf32>
    %cst_32 = arith.constant 0.000000e+00 : f32
    %73 = vector.broadcast %cst_32 : f32 to vector<16x32xf32>
    %74 = arith.maximumf %72, %73 : vector<16x32xf32>
    %75 = arith.truncf %74 : vector<16x32xf32> to vector<16x32xbf16>
    %cst_33 = arith.constant dense<0.000000e+00> : vector<24x32xf32>
    %76 = tpu.matmul %44, %75, %cst_33 {dimension_numbers = #tpu.dot_dimension_numbers<[1], [0], [0], [1], [0, 0, 1, 1], [], []>} : vector<24x16xbf16>, vector<16x32xbf16>, vector<24x32xf32> -> vector<24x32xf32>
    %77 = vector.broadcast %38 : vector<24x1xf32> to vector<24x32xf32>
    %78 = arith.mulf %76, %77 : vector<24x32xf32>
    %79 = arith.truncf %78 : vector<24x32xf32> to vector<24x32xbf16>
    %c0_34 = arith.constant 0 : index
    %c128_35 = arith.constant 128 : index
    %80 = vector.load %arg3[%c0_34, %c128_35] : memref<32x337xbf16, #tpu.memory_space<vmem>>, vector<32x32xbf16>
    %cst_36 = arith.constant dense<0.000000e+00> : vector<24x32xf32>
    %81 = tpu.matmul %79, %80, %cst_36 {dimension_numbers = #tpu.dot_dimension_numbers<[1], [0], [0], [1], [0, 0, 1, 1], [], []>} : vector<24x32xbf16>, vector<32x32xbf16>, vector<24x32xf32> -> vector<24x32xf32>
    %c0_37 = arith.constant 0 : index
    %c160 = arith.constant 160 : index
    %82 = vector.load %arg3[%c0_37, %c160] : memref<32x337xbf16, #tpu.memory_space<vmem>>, vector<32x32xbf16>
    %cst_38 = arith.constant dense<0.000000e+00> : vector<24x32xf32>
    %83 = tpu.matmul %60, %82, %cst_38 {dimension_numbers = #tpu.dot_dimension_numbers<[1], [0], [0], [1], [0, 0, 1, 1], [], []>} : vector<24x32xbf16>, vector<32x32xbf16>, vector<24x32xf32> -> vector<24x32xf32>
    %84 = arith.addf %81, %83 : vector<24x32xf32>
    %c0_39 = arith.constant 0 : index
    %c64_40 = arith.constant 64 : index
    %85 = vector.load %arg4[%c0_39, %c64_40] : memref<1x177xf32, #tpu.memory_space<vmem>>, vector<1x32xf32>
    %86 = vector.broadcast %85 : vector<1x32xf32> to vector<24x32xf32>
    %87 = arith.addf %84, %86 : vector<24x32xf32>
    %cst_41 = arith.constant dense<0.000000e+00> : vector<16x32xf32>
    %88 = tpu.matmul %45, %60, %cst_41 {dimension_numbers = #tpu.dot_dimension_numbers<[1], [0], [0], [1], [0, 0, 1, 1], [], []>} : vector<16x24xbf16>, vector<24x32xbf16>, vector<16x32xf32> -> vector<16x32xf32>
    %89 = vector.broadcast %43 : vector<16x1xf32> to vector<16x32xf32>
    %90 = arith.mulf %88, %89 : vector<16x32xf32>
    %91 = arith.truncf %90 : vector<16x32xf32> to vector<16x32xbf16>
    %c0_42 = arith.constant 0 : index
    %c192_43 = arith.constant 192 : index
    %92 = vector.load %arg3[%c0_42, %c192_43] : memref<32x337xbf16, #tpu.memory_space<vmem>>, vector<32x32xbf16>
    %cst_44 = arith.constant dense<0.000000e+00> : vector<16x32xf32>
    %93 = tpu.matmul %91, %92, %cst_44 {dimension_numbers = #tpu.dot_dimension_numbers<[1], [0], [0], [1], [0, 0, 1, 1], [], []>} : vector<16x32xbf16>, vector<32x32xbf16>, vector<16x32xf32> -> vector<16x32xf32>
    %c0_45 = arith.constant 0 : index
    %c224 = arith.constant 224 : index
    %94 = vector.load %arg3[%c0_45, %c224] : memref<32x337xbf16, #tpu.memory_space<vmem>>, vector<32x32xbf16>
    %cst_46 = arith.constant dense<0.000000e+00> : vector<16x32xf32>
    %95 = tpu.matmul %75, %94, %cst_46 {dimension_numbers = #tpu.dot_dimension_numbers<[1], [0], [0], [1], [0, 0, 1, 1], [], []>} : vector<16x32xbf16>, vector<32x32xbf16>, vector<16x32xf32> -> vector<16x32xf32>
    %96 = arith.addf %93, %95 : vector<16x32xf32>
    %c0_47 = arith.constant 0 : index
    %c96_48 = arith.constant 96 : index
    %97 = vector.load %arg4[%c0_47, %c96_48] : memref<1x177xf32, #tpu.memory_space<vmem>>, vector<1x32xf32>
    %98 = vector.broadcast %97 : vector<1x32xf32> to vector<16x32xf32>
    %99 = arith.addf %96, %98 : vector<16x32xf32>
    %c0_49 = arith.constant 0 : index
    %c0_50 = arith.constant 0 : index
    %100 = vector.load %arg6[%c0_49, %c0_50] : memref<40x32xf32, #tpu.memory_space<vmem>>, vector<16x32xf32>
    tpu.vector_store %arg6[%c0_49, %c0_50], %99 {strides = array<i32>} : memref<40x32xf32, #tpu.memory_space<vmem>>, vector<16x32xf32>,
    %c16 = arith.constant 16 : index
    %c0_51 = arith.constant 0 : index
    %101 = vector.load %arg6[%c16, %c0_51] : memref<40x32xf32, #tpu.memory_space<vmem>>, vector<24x32xf32>
    tpu.vector_store %arg6[%c16, %c0_51], %87 {strides = array<i32>} : memref<40x32xf32, #tpu.memory_space<vmem>>, vector<24x32xf32>,
    %102 = tpu.iota {dimensions = array<i32: 0>} : vector<16x20xi32>
    %103 = vector.broadcast %4 : vector<1x20xi32> to vector<16x20xi32>
    %104 = arith.cmpi eq, %102, %103 : vector<16x20xi32>
    %105 = arith.extui %104 : vector<16x20xi1> to vector<16x20xi32>
    %106 = arith.sitofp %105 : vector<16x20xi32> to vector<16x20xf32>
    %107 = arith.truncf %106 : vector<16x20xf32> to vector<16x20xbf16>
    %108 = arith.truncf %99 : vector<16x32xf32> to vector<16x32xbf16>
    %cst_52 = arith.constant dense<0.000000e+00> : vector<20x32xf32>
    %109 = tpu.matmul %107, %108, %cst_52 {dimension_numbers = #tpu.dot_dimension_numbers<[0], [0], [1], [1], [0, 1, 1, 1], [], []>} : vector<16x20xbf16>, vector<16x32xbf16>, vector<20x32xf32> -> vector<20x32xf32>
    %110 = tpu.iota {dimensions = array<i32: 0>} : vector<24x20xi32>
    %111 = vector.broadcast %5 : vector<1x20xi32> to vector<24x20xi32>
    %112 = arith.cmpi eq, %110, %111 : vector<24x20xi32>
    %113 = arith.extui %112 : vector<24x20xi1> to vector<24x20xi32>
    %114 = arith.sitofp %113 : vector<24x20xi32> to vector<24x20xf32>
    %115 = arith.truncf %114 : vector<24x20xf32> to vector<24x20xbf16>
    %116 = arith.truncf %87 : vector<24x32xf32> to vector<24x32xbf16>
    %cst_53 = arith.constant dense<0.000000e+00> : vector<20x32xf32>
    %117 = tpu.matmul %115, %116, %cst_53 {dimension_numbers = #tpu.dot_dimension_numbers<[0], [0], [1], [1], [0, 1, 1, 1], [], []>} : vector<24x20xbf16>, vector<24x32xbf16>, vector<20x32xf32> -> vector<20x32xf32>
    %118 = arith.truncf %109 : vector<20x32xf32> to vector<20x32xbf16>
    %c0_54 = arith.constant 0 : index
    %c256_55 = arith.constant 256 : index
    %119 = vector.load %arg3[%c0_54, %c256_55] : memref<32x337xbf16, #tpu.memory_space<vmem>>, vector<32x32xbf16>
    %cst_56 = arith.constant dense<0.000000e+00> : vector<20x32xf32>
    %120 = tpu.matmul %118, %119, %cst_56 {dimension_numbers = #tpu.dot_dimension_numbers<[1], [0], [0], [1], [0, 0, 1, 1], [], []>} : vector<20x32xbf16>, vector<32x32xbf16>, vector<20x32xf32> -> vector<20x32xf32>
    %121 = arith.truncf %117 : vector<20x32xf32> to vector<20x32xbf16>
    %c0_57 = arith.constant 0 : index
    %c288 = arith.constant 288 : index
    %122 = vector.load %arg3[%c0_57, %c288] : memref<32x337xbf16, #tpu.memory_space<vmem>>, vector<32x32xbf16>
    %cst_58 = arith.constant dense<0.000000e+00> : vector<20x32xf32>
    %123 = tpu.matmul %121, %122, %cst_58 {dimension_numbers = #tpu.dot_dimension_numbers<[1], [0], [0], [1], [0, 0, 1, 1], [], []>} : vector<20x32xbf16>, vector<32x32xbf16>, vector<20x32xf32> -> vector<20x32xf32>
    %124 = arith.addf %120, %123 : vector<20x32xf32>
    %c0_59 = arith.constant 0 : index
    %c128_60 = arith.constant 128 : index
    %125 = vector.load %arg4[%c0_59, %c128_60] : memref<1x177xf32, #tpu.memory_space<vmem>>, vector<1x32xf32>
    %126 = vector.broadcast %125 : vector<1x32xf32> to vector<20x32xf32>
    %127 = arith.addf %124, %126 : vector<20x32xf32>
    %cst_61 = arith.constant 0.000000e+00 : f32
    %128 = vector.broadcast %cst_61 : f32 to vector<20x32xf32>
    %129 = arith.cmpf oge, %127, %128 : vector<20x32xf32>
    %cst_62 = arith.constant 0.00999999977 : f32
    %130 = vector.broadcast %cst_62 : f32 to vector<20x32xf32>
    %131 = arith.mulf %130, %127 : vector<20x32xf32>
    %132 = arith.select %129, %127, %131 : vector<20x32xi1>, vector<20x32xf32>
    %133 = arith.truncf %132 : vector<20x32xf32> to vector<20x32xbf16>
    %c0_63 = arith.constant 0 : index
    %c320 = arith.constant 320 : index
    %134 = vector.load %arg3[%c0_63, %c320] : memref<32x337xbf16, #tpu.memory_space<vmem>>, vector<32x16xbf16>
    %cst_64 = arith.constant dense<0.000000e+00> : vector<20x16xf32>
    %135 = tpu.matmul %133, %134, %cst_64 {dimension_numbers = #tpu.dot_dimension_numbers<[1], [0], [0], [1], [0, 0, 1, 1], [], []>} : vector<20x32xbf16>, vector<32x16xbf16>, vector<20x16xf32> -> vector<20x16xf32>
    %c0_65 = arith.constant 0 : index
    %c160_66 = arith.constant 160 : index
    %136 = vector.load %arg4[%c0_65, %c160_66] : memref<1x177xf32, #tpu.memory_space<vmem>>, vector<1x16xf32>
    %137 = vector.broadcast %136 : vector<1x16xf32> to vector<20x16xf32>
    %138 = arith.addf %135, %137 : vector<20x16xf32>
    %cst_67 = arith.constant 0.000000e+00 : f32
    %139 = vector.broadcast %cst_67 : f32 to vector<20x16xf32>
    %140 = arith.cmpf oge, %138, %139 : vector<20x16xf32>
    %cst_68 = arith.constant 0.00999999977 : f32
    %141 = vector.broadcast %cst_68 : f32 to vector<20x16xf32>
    %142 = arith.mulf %141, %138 : vector<20x16xf32>
    %143 = arith.select %140, %138, %142 : vector<20x16xi1>, vector<20x16xf32>
    %144 = arith.truncf %143 : vector<20x16xf32> to vector<20x16xbf16>
    %c0_69 = arith.constant 0 : index
    %c336 = arith.constant 336 : index
    %145 = vector.load %arg3[%c0_69, %c336] : memref<32x337xbf16, #tpu.memory_space<vmem>>, vector<16x1xbf16>
    %cst_70 = arith.constant dense<0.000000e+00> : vector<20x1xf32>
    %146 = tpu.matmul %144, %145, %cst_70 {dimension_numbers = #tpu.dot_dimension_numbers<[1], [0], [0], [1], [0, 0, 1, 1], [], []>} : vector<20x16xbf16>, vector<16x1xbf16>, vector<20x1xf32> -> vector<20x1xf32>
    %c0_71 = arith.constant 0 : index
    %c176 = arith.constant 176 : index
    %147 = vector.load %arg4[%c0_71, %c176] : memref<1x177xf32, #tpu.memory_space<vmem>>, vector<1x1xf32>
    %148 = vector.broadcast %147 : vector<1x1xf32> to vector<20x1xf32>
    %149 = arith.addf %146, %148 : vector<20x1xf32>
    %cst_72 = arith.constant 0.000000e+00 : f32
    %150 = vector.broadcast %cst_72 : f32 to vector<20x1xf32>
    %151 = arith.subf %150, %149 : vector<20x1xf32>
    %152 = math.exp %151 : vector<20x1xf32>
    %cst_73 = arith.constant 1.000000e+00 : f32
    %153 = vector.broadcast %cst_73 : f32 to vector<20x1xf32>
    %154 = arith.addf %153, %152 : vector<20x1xf32>
    %155 = tpu.reciprocal %154 {approx = true} : vector<20x1xf32> -> vector<20x1xf32>
    %cst_74 = arith.constant 1.000000e+00 : f32
    %156 = vector.broadcast %cst_74 : f32 to vector<20x1xf32>
    %157 = arith.minimumf %155, %156 : vector<20x1xf32>
    %c0_75 = arith.constant 0 : index
    %c0_76 = arith.constant 0 : index
    %158 = vector.load %arg5[%c0_75, %c0_76] : memref<20x1xf32, #tpu.memory_space<vmem>>, vector<20x1xf32>
    tpu.vector_store %arg5[%c0_75, %c0_76], %157 {strides = array<i32>} : memref<20x1xf32, #tpu.memory_space<vmem>>, vector<20x1xf32>,
    return
  }
}

</mosaic_0001>

<bundles_post_ra>
// kernel: gnn_model_forward.1
= control target key start
LH: loop header
LB: loop body
LE: loop exit
PB: predicated region body
PF: predicated region fallthrough
CT: control target
= control target key end

     0   :  { %v31_v0 = vlaneseq  ;;  %v949_v6 = vmov 0.0   ;;  %vm53_vm4 = vcmask 523264   ;;  %s950_s25 = smov 64   ;;  %s951_s30 = smov 96   ;;  %vm119_vm7 = vcmask 130048   ;;  %s1219_s0 = inlined_call_operand.vmem [shape: s32[1,296], index: 0, kind: input, shape index: {}]   ;;  %s1220_s3 = inlined_call_operand.vmem [shape: bf16[32,337], index: 3, kind: input, shape index: {}]   ;;  %s1221_s1 = inlined_call_operand.vmem [shape: bf16[16,12], index: 1, kind: input, shape index: {}]   ;;  %s1222_s2 = inlined_call_operand.vmem [shape: bf16[24,10], index: 2, kind: input, shape index: {}]   ;;  %s1223_s4 = inlined_call_operand.vmem [shape: f32[1,177], index: 4, kind: input, shape index: {}]   ;;  %s1224_s6 = inlined_call_operand.vmem [shape: f32[40,32], index: 6, kind: output, shape index: {1}]   ;;  %s1225_s5 = inlined_call_operand.vmem [shape: f32[20,1], index: 5, kind: output, shape index: {0}]  }
   0x1   :  { %v922_v1 = vld [vmem:[%s1219_s0] ss:$0 sm:$0xff]  ;;  %v923_v3 = vld [vmem:[%s1219_s0 + $0x1] ss:$0 sm:$0xff]  ;;  %v186_v21 = vld [vmem:[%s1220_s3 + $0xc] sm:$0x1] }
   0x2   :  { %v994_v2 = vshrl.u32 %v31_v0, 7  ;;  %v184_v20 = vld [vmem:[%s1220_s3] sm:$0xf]  ;;  %v198_v23 = vunpack.c.l.b16 %v186_v21  ;;  %v30_v29 = vld [vmem:[%s1222_s2 + $0x8] sm:$0xf]  ;;  %vm279_vm8 = vcmask 1043456  }
   0x3   :  { %v197_v22 = vunpack.c.l.b16 %v184_v20  ;;  %v1036_v28 = vld [vmem:[%s1221_s1] sm:$0xff]  ;;  %v192_v30 = vunpack.c.l.b16 %v30_v29  ;;  %vm135_vm9 = vcmask 195584   ;;  %v185_v45 = vld [vmem:[%s1220_s3 + $0xc] sm:$0x3]  ;;  %s952_s13 = smov 32   ;;  %vm209_vm10 = vcmask 1044480  }
   0x4   :  { %v1000_v4 = vadd.s32 8, %v994_v2  ;;  %vm36_vm0 = vcmp.eq.s32.totalorder %v994_v2, %v922_v1  ;;  %v1004_v5 = vadd.s32 16, %v994_v2  ;;  %vm82_vm1 = vcmp.eq.s32.totalorder %v994_v2, %v923_v3  ;;  %168 = vmatpush.bf16.msra.mxu2 %v1036_v28  ;;  %v907_v35 = vld [vmem:[%s1222_s2] sm:$0xff]  ;;  %v870_v59 = vld [vmem:[%s1220_s3 + $0x1c] sm:$0xf] }
   0x5   :  { %v836_v7 = vsel %vm36_vm0, 1.0, %v949_v6  ;;  %v841_v8 = vsel %vm82_vm1, 1.0, %v949_v6  ;;  %v199_v24 = vpack.c.b16 %v198_v23, %v197_v22  ;;  %v194_v33 = vpack.c.b16 %v192_v30, %v192_v30  ;;  %v909_v60 = vld [vmem:[%s1220_s3 + $0x24] sm:$0xf0] }
   0x6   :  { %vm37_vm2 = vcmp.eq.s32.totalorder %v1000_v4, %v922_v1  ;;  %vm83_vm3 = vcmp.eq.s32.totalorder %v1000_v4, %v923_v3  ;;  %vm38_vm5 = vcmp.eq.s32.totalorder %v1004_v5, %v922_v1  ;;  %vm89_vm6 = vcmp.eq.s32.totalorder %v1004_v5, %v923_v3 }
   0x7   :  { %v837_v9 = vsel %vm37_vm2, 1.0, %v949_v6  ;;  %v842_v10 = vsel %vm83_vm3, 1.0, %v949_v6  ;;  %v838_v14 = vsel %vm38_vm5, 1.0, %v949_v6  ;;  %v843_v16 = vsel %vm89_vm6, 1.0, %v949_v6 }
   0x8   :  { %v45_v11 = vpack.c.bf16 %v837_v9, %v836_v7  ;;  %v88_v12 = vpack.c.bf16 %v842_v10, %v841_v8  ;;  %v46_v15 = vpack.c.bf16 %v838_v14, %v838_v14  ;;  %v92_v17 = vpack.c.bf16 %v843_v16, %v843_v16  ;;  %v1093_v14 = vld [vmem:[%s1223_s4] ss:$0 sm:$0xff]  ;;  %v908_v16 = vld [vmem:[%s1220_s3 + $0xc] sm:$0xf0] }
   0x9   :  { %v280_v34 = vsel %vm279_vm8, %v194_v33, 0  ;;  %v232_v48 = vunpack.c.l.b16 %v185_v45  ;;  %vm202_vm11 = vcmask 80896   ;;  %vm241_vm12 = vcmask 1045504  }
   0xa   :  { %49 = vrot.lane.b32.xlu0 %v45_v11, %s950_s25  ;;  %94 = vrot.lane.b32.xlu1 %v88_v12, %s950_s25  ;;  %v61_v13 = vsel %vm53_vm4, %v45_v11, 0  ;;  %v103_v18 = vsel %vm53_vm4, %v92_v17, 0  ;;  %v100_v19 = vsel %vm53_vm4, %v88_v12, 0  ;;  %v871_v62 = vor.u32 %v909_v60, %v870_v59 }
   0xb   :  { %70 = vmatpush.bf16.xpose.msra.mxu0 %v61_v13  ;;  %913 = vmatpush.bf16.xpose.msra.mxu1 %v61_v13  ;;  %v233_v49 = vpack.c.b16 %v232_v48, %v197_v22  ;;  %vm234_vm13 = vcmask 97280   ;;  %vm394_vm14 = vcmask 261120  }
   0xc   :  { %288 = vmatpush.bf16.msrb.mxu2 %v280_v34 }
   0xd   :  { %v243_v54 = vsel %vm241_vm12, %v233_v49, 0 }
  0x10   :  { %289 = vmatpush.bf16.msrb.mxu2 %v907_v35 }
  0x12   :  { %51 = vrot.lane.b32.xlu0 %v46_v15, %s950_s25  ;;  %200 = vrot.lane.b32.xlu1 %v199_v24, %s951_s30  ;;  %v866_v15 = vld [vmem:[%s1220_s3 + $0x4] sm:$0xf] }
  0x13   :  { %111 = vmatpush.bf16.xpose.msrb.mxu1 %v103_v18  ;;  %v867_v17 = vor.u32 %v908_v16, %v866_v15 }
  0x1b   :  { %112 = vmatpush.bf16.xpose.msrb.mxu1 %v100_v19 }
  0x7c   :  { %v50_v25 = vpop.permute.xlu0 %49  ;;  %v95_v27 = vpop.permute.xlu1 %94 }
  0x7d   :  { %839 = vmatmul.msk.bf16.vlgmr.msra.gmra.mxu0 %vm53_vm4, %v50_v25 }
  0x84   :  { %v52_v26 = vpop.permute.xlu0 %51  ;;  %v201_v51 = vpop.permute.xlu1 %200 }
  0x85   :  { %840 = vmatmul.msk.bf16.vlgmr.msra.gmra.mxu1 %vm53_vm4, %v52_v26  ;;  %v211_v52 = vsel %vm209_vm10, %v201_v51, 0 }
  0x86   :  { %220 = vmatpush.bf16.msra.mxu3 %v211_v52  ;;  %252 = vmatpush.bf16.msra.mxu1 %v243_v54 }
  0x89   :  { %855 = vmatmul.msk.bf16.vlgmr.msra.gmra.mxu3 %vm202_vm11, %v907_v35 }
  0x95   :  { %844 = vmatmul.msk.bf16.vlgmr.msrb.gmra.mxu1 %vm53_vm4, %v95_v27 }
  0x99   :  { %856 = vmatmul.msk.bf16.gmra.mxu3 %vm202_vm11, %v194_v33 }
  0xfa   :  { %v72_v31 = vpop.f32.mrf.mxu0 }
  0xfb   :  { %v120_v32 = vsel %vm119_vm7, %v72_v31, 0.0 }
  0xfc   :  { %121 = vadd.xlane.f32.xlu2 %v120_v32 }
 0x102   :  { %v74_v36 = vpop.f32.mrf.mxu0  ;;  %v77_v37 = vpop.f32.mrf.mxu1 }
 0x103   :  { %v1047_v38 = vpack.c.bf16 %v74_v36, %v72_v31  ;;  %v123_v39 = vsel %vm119_vm7, %v74_v36, 0.0  ;;  %v126_v40 = vsel %vm119_vm7, %v77_v37, 0.0  ;;  %v1053_v43 = vpack.c.bf16 %v77_v37, %v77_v37 }
 0x104   :  { %124 = vadd.xlane.f32.xlu2 %v123_v39 }
 0x105   :  { %849 = vmatmul.msk.bf16.vlgmr.msra.gmra.mxu2 %vm119_vm7, %v1047_v38 }
 0x10a   :  { %v79_v41 = vpop.f32.mrf.mxu1 }
 0x10c   :  { %127 = vadd.xlane.f32.xlu2 %v126_v40  ;;  %v222_v34 = vpop.f32.mrf.mxu3 }
 0x112   :  { %v114_v42 = vpop.f32.mrf.mxu1 }
 0x113   :  { %v136_v44 = vsel %vm135_vm9, %v114_v42, 0.0 }
 0x114   :  { %137 = vadd.xlane.f32.xlu0 %v136_v44  ;;  %v224_v35 = vpop.f32.mrf.mxu3 }
 0x115   :  { %850 = vmatmul.msk.bf16.gmra.mxu2 %vm119_vm7, %v1053_v43 }
 0x11a   :  { %v116_v46 = vpop.f32.mrf.mxu1 }
 0x11b   :  { %v139_v47 = vsel %vm135_vm9, %v116_v46, 0.0  ;;  %v1062_v50 = vpack.c.bf16 %v116_v46, %v114_v42 }
 0x11c   :  { %140 = vadd.xlane.f32.xlu1 %v139_v47  ;;  %v227_v37 = vpop.f32.mrf.mxu3 }
 0x124   :  { %299 = vrot.lane.b32.xlu2 %v233_v49, %s952_s13  ;;  %v229_v41 = vpop.f32.mrf.mxu3 }
 0x125   :  { %859 = vmatmul.msk.bf16.vlgmr.msrb.gmra.mxu2 %vm135_vm9, %v1062_v50 }
 0x128   :  { %390 = vrot.lane.b32.xlu0 %v871_v62, %s951_s30 }
 0x12c   :  { %321 = vrot.lane.b32.xlu2 %v199_v24, %s950_s25 }
 0x130   :  { %472 = vrot.lane.b32.xlu0 %v871_v62, %s952_s13 }
 0x134   :  { %343 = vrot.lane.b32.xlu2 %v1093_v14, %s951_s30 }
 0x135   :  { %495 = vrot.lane.b32.xlu1 %v871_v62, %s950_s25 }
 0x13c   :  { %388 = vrot.lane.b32.xlu2 %v867_v17, %s951_s30 }
 0x144   :  { %493 = vrot.lane.b32.xlu2 %v867_v17, %s950_s25 }
 0x14c   :  { %470 = vrot.lane.b32.xlu2 %v867_v17, %s952_s13 }
 0x154   :  { %516 = vrot.lane.b32.xlu2 %v1093_v14, %s952_s13 }
 0x16f   :  { %v122_v53 = vpop.xlane.xlu2 %121 }
 0x170   :  { %v129_v57 = vmax.f32 %v122_v53, 1.0 }
 0x172   :  { %927 = vrcp.f32 %v129_v57 }
 0x177   :  { %v125_v55 = vpop.xlane.xlu2 %124 }
 0x178   :  { %v130_v58 = vmax.f32 %v125_v55, 1.0  ;;  %v1081_v1 = vpop.eup %927 }
 0x17a   :  { %929 = vrcp.f32 %v130_v58 }
 0x17f   :  { %v128_v56 = vpop.xlane.xlu2 %127 }
 0x180   :  { %v1083_v3 = vpop.eup %929  ;;  %v131_v13 = vmax.f32 %v128_v56, 1.0 }
 0x182   :  { %931 = vrcp.f32 %v131_v13 }
 0x187   :  { %v300_v61 = vpop.permute.xlu2 %299  ;;  %v138_v22 = vpop.xlane.xlu0 %137 }
 0x188   :  { %v170_v63 = vpop.f32.mrf.mxu2  ;;  %v305_v0 = vsel %vm241_vm12, %v300_v61, 0  ;;  %v1103_v19 = vpop.eup %931  ;;  %v142_v25 = vmax.f32 %v138_v22, 1.0 }
 0x189   :  { %314 = vmatpush.bf16.msrb.mxu3 %v305_v0  ;;  %v179_v9 = vmul.f32 %v1081_v1, %v170_v63 }
 0x18a   :  { %933 = vrcp.f32 %v142_v25 }
 0x18c   :  { %860 = vmatmul.msk.bf16.vlgmr.msrb.gmra.mxu3 %vm234_vm13, %v1036_v28 }
 0x18f   :  { %v322_v8 = vpop.permute.xlu2 %321  ;;  %v141_v23 = vpop.xlane.xlu1 %140 }
 0x190   :  { %v172_v7 = vpop.f32.mrf.mxu2  ;;  %v327_v11 = vsel %vm209_vm10, %v322_v8, 0  ;;  %v143_v26 = vmax.f32 %v141_v23, 1.0  ;;  %v1109_v28 = vpop.eup %933 }
 0x191   :  { %v180_v10 = vmul.f32 %v1083_v3, %v172_v7  ;;  %336 = vmatpush.bf16.msrb.mxu0 %v327_v11  ;;  %v925_v7 = vld [vmem:[%s1219_s0 + $0x2] ss:$0 sm:$0xff]  ;;  %s953_s0 = smov 108  }
 0x192   :  { %935 = vrcp.f32 %v143_v26  ;;  %vm527_vm15 = vcmp.eq.s32.totalorder %v994_v2, %v925_v7  ;;  %vm528_vm0 = vcmp.eq.s32.totalorder %v1000_v4, %v925_v7  ;;  %vm575_vm1 = vcmp.eq.s32.totalorder %v1004_v5, %v925_v7 }
 0x193   :  { %v182_v12 = vpack.c.bf16 %v180_v10, %v179_v9  ;;  %v879_v9 = vsel %vm527_vm15, 1.0, %v949_v6  ;;  %v880_v10 = vsel %vm528_vm0, 1.0, %v949_v6  ;;  %v883_v11 = vsel %vm575_vm1, 1.0, %v949_v6 }
 0x194   :  { %v533_v13 = vpack.c.bf16 %v880_v10, %v879_v9  ;;  %v578_v15 = vpack.c.bf16 %v883_v11, %v883_v11 }
 0x195   :  { %433 = vmatpush.bf16.msra.mxu0 %v871_v62  ;;  %857 = vmatmul.msk.bf16.vlgmr.msra.gmra.mxu1 %vm234_vm13, %v182_v12 }
 0x196   :  { %583 = vrot.lane.b32.xlu1 %v533_v13, %s953_s0  ;;  %585 = vrot.lane.b32.xlu0 %v578_v15, %s953_s0 }
 0x197   :  { %v344_v36 = vpop.permute.xlu2 %343 }
 0x198   :  { %v175_v18 = vpop.f32.mrf.mxu2  ;;  %v1112_v29 = vpop.eup %935 }
 0x199   :  { %434 = vmatpush.bf16.msra.mxu0 %v867_v17  ;;  %v181_v20 = vmul.f32 %v1103_v19, %v175_v18 }
 0x19a   :  { %v391_v39 = vpop.permute.xlu0 %390 }
 0x19b   :  { %v183_v24 = vpack.c.bf16 %v181_v20, %v181_v20  ;;  %407 = vmatpush.bf16.msra.mxu3 %v391_v39 }
 0x19e   :  { %445 = vrot.lane.b32.xlu1 %v1093_v14, %s950_s25 }
 0x19f   :  { %v389_v40 = vpop.permute.xlu2 %388 }
 0x1a0   :  { %v177_v21 = vpop.f32.mrf.mxu2  ;;  %408 = vmatpush.bf16.msra.mxu3 %v389_v40 }
 0x1a2   :  { %v473_v61 = vpop.permute.xlu0 %472 }
 0x1a5   :  { %858 = vmatmul.msk.bf16.gmra.mxu1 %vm234_vm13, %v183_v24 }
 0x1a7   :  { %v494_v57 = vpop.permute.xlu2 %493  ;;  %v496_v5 = vpop.permute.xlu1 %495 }
 0x1a8   :  { %v291_v27 = vpop.f32.mrf.mxu2 }
 0x1a9   :  { %v296_v31 = vmul.f32 %v1109_v28, %v291_v27 }
 0x1af   :  { %v471_v0 = vpop.permute.xlu2 %470 }
 0x1b0   :  { %v293_v30 = vpop.f32.mrf.mxu2 }
 0x1b1   :  { %v297_v32 = vmul.f32 %v1112_v29, %v293_v30 }
 0x1b3   :  { %v298_v33 = vpack.c.bf16 %v297_v32, %v296_v31 }
 0x1b5   :  { %861 = vmatmul.msk.bf16.vlgmr.msrb.gmra.mxu0 %vm202_vm11, %v298_v33 }
 0x1b7   :  { %v517_v41 = vpop.permute.xlu2 %516 }
 0x1b8   :  { %535 = vxpose.xlu0.c.b16.start.end [1/1] (short) (narrow) %v533_v13, 32 }
 0x208   :  { %v584_v22 = vpop.permute.xlu1 %583 }
 0x209   :  { %589 = vxpose.xlu2.c.b16.start [1/2] (short) (narrow) %v584_v22, 32 }
 0x20f   :  { %v316_v62 = vpop.f32.mrf.mxu3 }
 0x212   :  { %v254_v42 = vpop.f32.mrf.mxu1 }
 0x213   :  { %v255_v44 = vadd.f32 %v254_v42, %v222_v34 }
 0x215   :  { %v267_v46 = vadd.f32 %v1093_v14, %v255_v44 }
 0x217   :  { %v270_v49 = vmax.f32 %v267_v46, 0.0  ;;  %v318_v12 = vpop.f32.mrf.mxu3 }
 0x21a   :  { %v256_v45 = vpop.f32.mrf.mxu1 }
 0x21b   :  { %v257_v47 = vadd.f32 %v256_v45, %v224_v35 }
 0x21d   :  { %v268_v48 = vadd.f32 %v1093_v14, %v257_v47  ;;  %v892_v47 = vld [vmem:[%s1220_s3 + $0x20] sm:$0xf] }
 0x21f   :  { %v271_v51 = vmax.f32 %v268_v48, 0.0  ;;  %v911_v48 = vld [vmem:[%s1220_s3 + $0x28] sm:$0xf0] }
 0x221   :  { %v273_v52 = vpack.c.bf16 %v271_v51, %v270_v49  ;;  %v446_v51 = vpop.permute.xlu1 %445 }
 0x222   :  { %v259_v53 = vpop.f32.mrf.mxu1 }
 0x223   :  { %v260_v54 = vadd.f32 %v259_v53, %v227_v37  ;;  %872 = vmatmul.msk.bf16.vlgmr.msra.gmra.mxu3 %vm394_vm14, %v273_v52 }
 0x225   :  { %v269_v55 = vadd.f32 %v1093_v14, %v260_v54  ;;  %v888_v54 = vld [vmem:[%s1220_s3 + $0x8] sm:$0xf] }
 0x227   :  { %v272_v56 = vmax.f32 %v269_v55, 0.0  ;;  %v910_v55 = vld [vmem:[%s1220_s3 + $0x10] sm:$0xf0] }
 0x229   :  { %v274_v58 = vpack.c.bf16 %v272_v56, %v272_v56 }
 0x22a   :  { %v261_v59 = vpop.f32.mrf.mxu1 }
 0x22b   :  { %v451_v60 = vsel %vm279_vm8, %v274_v58, 0 }
 0x22c   :  { %459 = vmatpush.bf16.msrb.mxu1 %v451_v60 }
 0x230   :  { %460 = vmatpush.bf16.msrb.mxu1 %v273_v52  ;;  %v893_v52 = vor.u32 %v911_v48, %v892_v47 }
 0x232   :  { %v338_v63 = vpop.f32.mrf.mxu0  ;;  %652 = vrot.lane.b32.xlu1 %v893_v52, %s951_s30 }
 0x233   :  { %873 = vmatmul.msk.bf16.gmra.mxu3 %vm394_vm14, %v274_v58  ;;  %876 = vmatmul.msk.bf16.vlgmr.msrb.gmra.mxu1 %vm135_vm9, %v1062_v50  ;;  %v339_v8 = vadd.f32 %v338_v63, %v316_v62 }
 0x234   :  { %485 = vmatpush.bf16.msra.mxu1 %v473_v61 }
 0x235   :  { %v346_v16 = vadd.f32 %v344_v36, %v339_v8 }
 0x237   :  { %v348_v18 = vmax.f32 %v346_v16, 0.0 }
 0x238   :  { %486 = vmatpush.bf16.msra.mxu1 %v471_v0 }
 0x23a   :  { %v340_v50 = vpop.f32.mrf.mxu0 }
 0x23b   :  { %v341_v17 = vadd.f32 %v340_v50, %v318_v12 }
 0x23d   :  { %v347_v2 = vadd.f32 %v344_v36, %v341_v17 }
 0x23f   :  { %v349_v4 = vmax.f32 %v347_v2, 0.0 }
 0x241   :  { %v350_v20 = vpack.c.bf16 %v349_v4, %v348_v18 }
 0x243   :  { %358 = vmatpush.bf16.msra.mxu2 %v350_v20  ;;  %877 = vmatmul.msk.bf16.vlgmr.msra.gmra.mxu1 %vm394_vm14, %v350_v20 }
 0x246   :  { %862 = vmatmul.msk.bf16.vlgmr.msra.gmra.mxu2 %vm119_vm7, %v1047_v38  ;;  %v586_v38 = vpop.permute.xlu0 %585 }
 0x247   :  { %508 = vmatpush.bf16.msrb.mxu2 %v496_v5  ;;  %590 = vxpose.xlu2.c.b16.end [2/2] (short) (narrow) %v586_v38, 32 }
 0x24b   :  { %509 = vmatpush.bf16.msrb.mxu2 %v494_v57  ;;  %v889_v57 = vor.u32 %v910_v55, %v888_v54 }
 0x24d   :  { %650 = vrot.lane.b32.xlu1 %v889_v57, %s951_s30 }
 0x24f   :  { %694 = vmatpush.bf16.msra.mxu2 %v893_v52 }
 0x253   :  { %695 = vmatpush.bf16.msra.mxu2 %v889_v57 }
 0x255   :  { %726 = vrot.lane.b32.xlu1 %v893_v52, %s950_s25 }
 0x256   :  { %863 = vmatmul.msk.bf16.gmra.mxu2 %vm119_vm7, %v1053_v43 }
 0x25d   :  { %724 = vrot.lane.b32.xlu1 %v889_v57, %s950_s25 }
 0x264   :  { %v543_v46 = vpop.trf.xlu0 }
 0x274   :  { %v544_v61 = vpop.trf.xlu0 }
 0x2a4   :  { %v653_v50 = vpop.permute.xlu1 %652 }
 0x2a5   :  { %668 = vmatpush.bf16.msrb.mxu1 %v653_v50 }
 0x2a6   :  { %v410_v6 = vpop.f32.mrf.mxu3 }
 0x2ae   :  { %v412_v21 = vpop.f32.mrf.mxu3 }
 0x2b0   :  { %v462_v23 = vpop.f32.mrf.mxu1 }
 0x2b1   :  { %v467_v26 = vmul.f32 %v1109_v28, %v462_v23 }
 0x2b6   :  { %v415_v24 = vpop.f32.mrf.mxu3 }
 0x2b8   :  { %v464_v25 = vpop.f32.mrf.mxu1 }
 0x2b9   :  { %v468_v14 = vmul.f32 %v1112_v29, %v464_v25 }
 0x2bb   :  { %v469_v27 = vpack.c.bf16 %v468_v14, %v467_v26 }
 0x2bd   :  { %878 = vmatmul.msk.bf16.vlgmr.msrb.gmra.mxu2 %vm394_vm14, %v469_v27 }
 0x2be   :  { %v417_v43 = vpop.f32.mrf.mxu3 }
 0x2bf   :  { %v651_v13 = vpop.permute.xlu1 %650 }
 0x2c0   :  { %v488_v37 = vpop.f32.mrf.mxu1  ;;  %669 = vmatpush.bf16.msrb.mxu1 %v651_v13 }
 0x2c7   :  { %v727_v25 = vpop.permute.xlu1 %726 }
 0x2c9   :  { %v360_v30 = vpop.f32.mrf.mxu2 }
 0x2ca   :  { %v369_v32 = vmul.f32 %v1081_v1, %v360_v30  ;;  %v490_v1 = vpop.f32.mrf.mxu1  ;;  %v902_v30 = vld [vmem:[%s1220_s3 + $0x8] sm:$0xf] }
 0x2cf   :  { %v725_v14 = vpop.permute.xlu1 %724 }
 0x2d1   :  { %v362_v31 = vpop.f32.mrf.mxu2 }
 0x2d2   :  { %v370_v33 = vmul.f32 %v1083_v3, %v362_v31  ;;  %v912_v31 = vld [vmem:[%s1220_s3 + $0x10] sm:$0xf0]  ;;  %s955_s3 = smov 80  }
 0x2d4   :  { %v372_v34 = vpack.c.bf16 %v370_v33, %v369_v32  ;;  %v903_v33 = vor.u32 %v912_v31, %v902_v30 }
 0x2d6   :  { %874 = vmatmul.msk.bf16.vlgmr.msra.gmra.mxu0 %vm394_vm14, %v372_v34 }
 0x2d8   :  { %v597_v11 = vpop.trf.xlu2 }
 0x2d9   :  { %v365_v35 = vpop.f32.mrf.mxu2 }
 0x2da   :  { %v371_v28 = vmul.f32 %v1103_v19, %v365_v35 }
 0x2dc   :  { %v373_v29 = vpack.c.bf16 %v371_v28, %v371_v28 }
 0x2e1   :  { %v367_v36 = vpop.f32.mrf.mxu2 }
 0x2e6   :  { %875 = vmatmul.msk.bf16.gmra.mxu0 %vm394_vm14, %v373_v29 }
 0x2e8   :  { %v598_v12 = vpop.trf.xlu2 }
 0x340   :  { %v511_v39 = vpop.f32.mrf.mxu2 }
 0x341   :  { %v512_v40 = vadd.f32 %v511_v39, %v488_v37 }
 0x343   :  { %v519_v42 = vadd.f32 %v517_v41, %v512_v40 }
 0x345   :  { %521 = vst.msk [vmem:[%s1224_s6] sm:$0xff] %vm394_vm14, %v519_v42 }
 0x348   :  { %v513_v3 = vpop.f32.mrf.mxu2 }
 0x349   :  { %v514_v44 = vadd.f32 %v513_v3, %v490_v1 }
 0x34b   :  { %v520_v45 = vadd.f32 %v517_v41, %v514_v44 }
 0x34d   :  { %522 = vst.msk [vmem:[%s1224_s6 + $0x8] sm:$0xff] %vm394_vm14, %v520_v45  ;;  %v534_v19 = vpack.c.bf16 %v520_v45, %v519_v42 }
 0x34f   :  { %564 = vmatpush.bf16.msrb.mxu3 %v534_v19 }
 0x352   :  { %881 = vmatmul.msk.bf16.vlgmr.msrb.gmra.mxu3 %vm119_vm7, %v543_v46 }
 0x353   :  { %v436_v49 = vpop.f32.mrf.mxu0  ;;  %745 = vmatpush.bf16.msra.mxu3 %v727_v25 }
 0x354   :  { %v437_v53 = vadd.f32 %v436_v49, %v410_v6 }
 0x356   :  { %v448_v56 = vadd.f32 %v446_v51, %v437_v53 }
 0x357   :  { %746 = vmatpush.bf16.msra.mxu3 %v725_v14 }
 0x358   :  { %523 = vst.msk [vmem:[%s1224_s6 + $0x10] sm:$0xff] %vm394_vm14, %v448_v56 }
 0x35b   :  { %v438_v58 = vpop.f32.mrf.mxu0 }
 0x35c   :  { %v439_v59 = vadd.f32 %v438_v58, %v412_v21 }
 0x35e   :  { %v449_v60 = vadd.f32 %v446_v51, %v439_v59 }
 0x360   :  { %524 = vst.msk [vmem:[%s1224_s6 + $0x18] sm:$0xff] %vm394_vm14, %v449_v60  ;;  %v579_v10 = vpack.c.bf16 %v449_v60, %v448_v56 }
 0x362   :  { %882 = vmatmul.msk.bf16.gmra.mxu3 %vm119_vm7, %v544_v61 }
 0x363   :  { %v441_v62 = vpop.f32.mrf.mxu0 }
 0x364   :  { %v442_v63 = vadd.f32 %v441_v62, %v415_v24  ;;  %v926_v24 = vld [vmem:[%s1223_s4 + $0x1] ss:$0 sm:$0xff]  ;;  %s954_s4 = smov 48  }
 0x365   :  { %730 = vrot.lane.b32.xlu0 %v926_v24, %s951_s30  ;;  %775 = vrot.lane.b32.xlu1 %v903_v33, %s954_s4 }
 0x366   :  { %v450_v0 = vadd.f32 %v446_v51, %v442_v63 }
 0x368   :  { %525 = vst.msk [vmem:[%s1224_s6 + $0x20] sm:$0xff] %vm394_vm14, %v450_v0  ;;  %v580_v7 = vpack.c.bf16 %v450_v0, %v450_v0 }
 0x36a   :  { %v612_v8 = vsel %vm279_vm8, %v580_v7, 0 }
 0x36b   :  { %v443_v9 = vpop.f32.mrf.mxu0  ;;  %620 = vmatpush.bf16.msrb.mxu0 %v612_v8 }
 0x36d   :  { %778 = vrot.lane.b32.xlu1 %v926_v24, %s955_s3 }
 0x36f   :  { %621 = vmatpush.bf16.msrb.mxu0 %v579_v10 }
 0x372   :  { %884 = vmatmul.msk.bf16.vlgmr.msrb.gmra.mxu0 %vm135_vm9, %v597_v11 }
 0x382   :  { %885 = vmatmul.msk.bf16.gmra.mxu0 %vm135_vm9, %v598_v12  ;;  %vm826_vm9 = vcmask 3072  }
 0x3d5   :  { %v566_v15 = vpop.f32.mrf.mxu3 }
 0x3d7   :  { %v776_v48 = vpop.permute.xlu1 %775  ;;  %v731_v51 = vpop.permute.xlu0 %730 }
 0x3d8   :  { %794 = vmatpush.bf16.msra.mxu0 %v776_v48 }
 0x3dd   :  { %v568_v16 = vpop.f32.mrf.mxu3 }
 0x3de   :  { %v632_v17 = vpack.c.bf16 %v568_v16, %v566_v15 }
 0x3df   :  { %v779_v8 = vpop.permute.xlu1 %778 }
 0x3e0   :  { %896 = vmatmul.msk.bf16.vlgmr.msra.gmra.mxu2 %vm394_vm14, %v632_v17 }
 0x3e5   :  { %v571_v2 = vpop.f32.mrf.mxu3 }
 0x3e6   :  { %v633_v18 = vpack.c.bf16 %v571_v2, %v571_v2 }
 0x3ed   :  { %v573_v4 = vpop.f32.mrf.mxu3 }
 0x3ef   :  { %v623_v20 = vpop.f32.mrf.mxu0 }
 0x3f0   :  { %897 = vmatmul.msk.bf16.gmra.mxu2 %vm394_vm14, %v633_v18 }
 0x3f7   :  { %v625_v5 = vpop.f32.mrf.mxu0 }
 0x3f8   :  { %v638_v6 = vpack.c.bf16 %v625_v5, %v623_v20 }
 0x3fa   :  { %894 = vmatmul.msk.bf16.vlgmr.msrb.gmra.mxu1 %vm394_vm14, %v638_v6 }
 0x3ff   :  { %v628_v21 = vpop.f32.mrf.mxu0 }
 0x400   :  { %v639_v22 = vpack.c.bf16 %v628_v21, %v628_v21 }
 0x407   :  { %v630_v23 = vpop.f32.mrf.mxu0 }
 0x40a   :  { %895 = vmatmul.msk.bf16.gmra.mxu1 %vm394_vm14, %v639_v22 }
 0x463   :  { %v697_v26 = vpop.f32.mrf.mxu2 }
 0x46b   :  { %v699_v27 = vpop.f32.mrf.mxu2 }
 0x473   :  { %v702_v38 = vpop.f32.mrf.mxu2 }
 0x477   :  { %v671_v43 = vpop.f32.mrf.mxu1 }
 0x478   :  { %v698_v32 = vadd.f32 %v697_v26, %v671_v43 }
 0x47a   :  { %v710_v35 = vadd.f32 %v926_v24, %v698_v32 }
 0x47b   :  { %v704_v34 = vpop.f32.mrf.mxu2 }
 0x47c   :  { %v716_v29 = vmul.f32 0.01, %v710_v35  ;;  %vm713_vm2 = vcmp.ge.f32.partialorder %v710_v35, 0.0 }
 0x47e   :  { %v719_v40 = vsel %vm713_vm2, %v710_v35, %v716_v29 }
 0x47f   :  { %v673_v28 = vpop.f32.mrf.mxu1 }
 0x480   :  { %v700_v36 = vadd.f32 %v699_v27, %v673_v28 }
 0x482   :  { %v711_v37 = vadd.f32 %v926_v24, %v700_v36 }
 0x484   :  { %vm714_vm3 = vcmp.ge.f32.partialorder %v711_v37, 0.0  ;;  %v717_v39 = vmul.f32 0.01, %v711_v37 }
 0x486   :  { %v720_v41 = vsel %vm714_vm3, %v711_v37, %v717_v39 }
 0x487   :  { %v722_v42 = vpack.c.bf16 %v720_v41, %v719_v40  ;;  %v676_v1 = vpop.f32.mrf.mxu1 }
 0x488   :  { %v703_v3 = vadd.f32 %v702_v38, %v676_v1 }
 0x489   :  { %898 = vmatmul.msk.bf16.vlgmr.msra.gmra.mxu3 %vm394_vm14, %v722_v42 }
 0x48a   :  { %v712_v44 = vadd.f32 %v926_v24, %v703_v3 }
 0x48c   :  { %v718_v45 = vmul.f32 0.01, %v712_v44  ;;  %vm715_vm4 = vcmp.ge.f32.partialorder %v712_v44, 0.0 }
 0x48e   :  { %v721_v46 = vsel %vm715_vm4, %v712_v44, %v718_v45 }
 0x48f   :  { %v678_v19 = vpop.f32.mrf.mxu1  ;;  %v723_v47 = vpack.c.bf16 %v721_v46, %v721_v46 }
 0x499   :  { %899 = vmatmul.msk.bf16.gmra.mxu3 %vm394_vm14, %v723_v47 }
 0x50c   :  { %v748_v49 = vpop.f32.mrf.mxu3 }
 0x50d   :  { %v749_v52 = vadd.f32 %v748_v49, %v731_v51 }
 0x50f   :  { %v760_v54 = vmul.f32 0.01, %v749_v52  ;;  %vm757_vm5 = vcmp.ge.f32.partialorder %v749_v52, 0.0 }
 0x511   :  { %v763_v57 = vsel %vm757_vm5, %v749_v52, %v760_v54 }
 0x514   :  { %v750_v53 = vpop.f32.mrf.mxu3 }
 0x515   :  { %v751_v55 = vadd.f32 %v750_v53, %v731_v51 }
 0x517   :  { %vm758_vm6 = vcmp.ge.f32.partialorder %v751_v55, 0.0  ;;  %v761_v56 = vmul.f32 0.01, %v751_v55 }
 0x519   :  { %v764_v58 = vsel %vm758_vm6, %v751_v55, %v761_v56 }
 0x51a   :  { %v766_v59 = vpack.c.bf16 %v764_v58, %v763_v57 }
 0x51c   :  { %904 = vmatmul.msk.bf16.vlgmr.msra.gmra.mxu0 %vm119_vm7, %v766_v59  ;;  %v753_v60 = vpop.f32.mrf.mxu3 }
 0x51d   :  { %v754_v61 = vadd.f32 %v753_v60, %v731_v51 }
 0x51f   :  { %v762_v62 = vmul.f32 0.01, %v754_v61  ;;  %vm759_vm8 = vcmp.ge.f32.partialorder %v754_v61, 0.0 }
 0x521   :  { %v765_v0 = vsel %vm759_vm8, %v754_v61, %v762_v62 }
 0x522   :  { %v767_v7 = vpack.c.bf16 %v765_v0, %v765_v0 }
 0x524   :  { %v755_v63 = vpop.f32.mrf.mxu3 }
 0x52c   :  { %905 = vmatmul.msk.bf16.gmra.mxu0 %vm119_vm7, %v767_v7  ;;  %vm823_vm7 = vcmask 7168  }
 0x599   :  { %v796_v9 = vpop.f32.mrf.mxu0 }
 0x59a   :  { %v797_v10 = vadd.f32 %v796_v9, %v779_v8 }
 0x59c   :  { %v805_v11 = vsub.f32 0.0, %v797_v10 }
 0x59e   :  { %v808_v12 = vmul.f32 1.442695, %v805_v11 }
 0x5a0   :  { %937 = vpow2.f32 %v808_v12 }
 0x5a1   :  { %v798_v50 = vpop.f32.mrf.mxu0 }
 0x5a2   :  { %v799_v13 = vadd.f32 %v798_v50, %v779_v8 }
 0x5a4   :  { %v806_v15 = vsub.f32 0.0, %v799_v13 }
 0x5a6   :  { %v938_v16 = vpop.eup %937  ;;  %v810_v17 = vmul.f32 1.442695, %v806_v15 }
 0x5a7   :  { %v814_v2 = vadd.f32 1.0, %v938_v16 }
 0x5a8   :  { %939 = vpow2.f32 %v810_v17 }
 0x5a9   :  { %941 = vrcp.f32 %v814_v2  ;;  %v801_v18 = vpop.f32.mrf.mxu0 }
 0x5aa   :  { %v802_v4 = vadd.f32 %v801_v18, %v779_v8 }
 0x5ac   :  { %v807_v20 = vsub.f32 0.0, %v802_v4 }
 0x5ae   :  { %v940_v5 = vpop.eup %939  ;;  %v812_v6 = vmul.f32 1.442695, %v807_v20 }
 0x5af   :  { %v942_v21 = vpop.eup %941  ;;  %v815_v22 = vadd.f32 1.0, %v940_v5 }
 0x5b0   :  { %v820_v23 = vmin.f32 %v942_v21, 1.0  ;;  %943 = vpow2.f32 %v812_v6 }
 0x5b1   :  { %945 = vrcp.f32 %v815_v22  ;;  %v803_v24 = vpop.f32.mrf.mxu0 }
 0x5b2   :  { %824 = vst.msk [vmem:[%s1225_s5] sm:$0xff] %vm823_vm7, %v820_v23 }
 0x5b6   :  { %v944_v25 = vpop.eup %943 }
 0x5b7   :  { %v946_v26 = vpop.eup %945  ;;  %v816_v14 = vadd.f32 1.0, %v944_v25 }
 0x5b8   :  { %v821_v27 = vmin.f32 %v946_v26, 1.0 }
 0x5b9   :  { %947 = vrcp.f32 %v816_v14 }
 0x5ba   :  { %825 = vst.msk [vmem:[%s1225_s5 + $0x8] sm:$0xff] %vm823_vm7, %v821_v27 }
 0x5bf   :  { %v948_v38 = vpop.eup %947 }
 0x5c0   :  { %v822_v43 = vmin.f32 %v948_v38, 1.0 }
 0x5c2   :  { %827 = vst.msk [vmem:[%s1225_s5 + $0x10] sm:$0xf] %vm826_vm9, %v822_v43 }

</bundles_post_ra>
